<compile_context>
chip_gen: v6e
topology: v6e:2x2x1
jax: 0.10.0
libtpu: 0.0.40
codegen_flags: <defaults>
</compile_context>

<pallas_src>
import numpy as np
import jax
import jax.numpy as jnp
from jax.experimental import pallas as pl
from jax.experimental.pallas import tpu as pltpu

_TAYLOR_TERMS = 20   # recurrence terms are ~free; remainder << 1e-9 vs the 30-term reference
_SUB = 8             # sublanes per compute tile
_LANES = 128         # lanes per compute tile


def _edge_idx(i, j, d):
    """Edge-vector index of adjacency entry (i, j), i != j (matches vec_to_adj_mat)."""
    return i * (d - 1) + ((j - i - 1) % d)


def _dagness_d4(G, n_terms):
    """tr(exp(G)) - 4 for a 4x4 binary adjacency with zero diagonal.

    G(i, j) returns the (8,128) tile holding entry (i, j) across the batch tile.
    Builds G^2 explicitly (structural zeros of diag(G) skipped), takes tr(G^2..G^4),
    derives the characteristic-polynomial coefficients via Newton's identities and
    generates tr(G^k), k >= 5, with the Cayley-Hamilton trace recurrence.
    Unscaled traces reach ~3^20 ~ 3.5e9, well within f32 relative precision for the
    1e-4 tolerance.
    """
    d = 4
    G2 = [[None] * d for _ in range(d)]
    for i in range(d):
        for j in range(d):
            ks = [k for k in range(d) if k != i and k != j]
            acc = G(i, ks[0]) * G(ks[0], j)
            for k in ks[1:]:
                acc = acc + G(i, k) * G(k, j)
            G2[i][j] = acc

    p2 = G2[0][0] + G2[1][1] + G2[2][2] + G2[3][3]        # tr(G^2)
    p3 = None                                             # tr(G^3)
    p4 = G2[0][0] * G2[0][0]                              # tr(G^4)
    for i in range(1, d):
        p4 = p4 + G2[i][i] * G2[i][i]
    for i in range(d):
        for j in range(d):
            if i == j:
                continue
            t3 = G2[i][j] * G(j, i)
            p3 = t3 if p3 is None else p3 + t3
            p4 = p4 + G2[i][j] * G2[j][i]

    # Newton's identities with p1 = tr(G) = 0  ->  e1 = 0.
    a = p2 * 0.5                          # -e2
    b = p3 * (1.0 / 3.0)                  #  e3
    c = (p4 - p2 * p2 * 0.5) * 0.25       # -e4

    inv_f = 0.5
    dag = p2 * inv_f
    inv_f /= 3.0
    dag = dag + p3 * inv_f
    inv_f /= 4.0
    dag = dag + p4 * inv_f

    # tr(G^k) = a*tr(G^{k-2}) + b*tr(G^{k-3}) + c*tr(G^{k-4})  (k >= 5; p1 = 0)
    q1, q2, q3, q4 = p4, p3, p2, None
    for k in range(5, n_terms + 1):
        pk = a * q2 + b * q3
        if q4 is not None:
            pk = pk + c * q4
        inv_f /= k
        dag = dag + pk * inv_f
        q1, q2, q3, q4 = pk, q1, q2, q3
    return dag


def _dagness_generic(G, d, n_terms):
    """Fallback for d != 4: unrolled Taylor matmul with structural-zero skipping,
    deferred 1/k! scaling and trace-only accumulation."""
    term = [[None if i == j else G(i, j) for j in range(d)] for i in range(d)]
    dag = None
    inv_f = 1.0
    for k in range(2, n_terms + 1):
        inv_f /= k
        new_term = [[None] * d for _ in range(d)]
        for i in range(d):
            for c in range(d):
                acc = None
                for j in range(d):
                    if j == c or term[i][j] is None:     # G[j][c] = 0 when j == c
                        continue
                    prod = term[i][j] * G(j, c)
                    acc = prod if acc is None else acc + prod
                new_term[i][c] = acc
        term = new_term
        diag = None
        for i in range(d):
            if term[i][i] is None:
                continue
            diag = term[i][i] if diag is None else diag + term[i][i]
        if diag is not None:
            dag = diag * inv_f if dag is None else dag + diag * inv_f
    if dag is None:
        dag = G(0, 1) * 0.0
    return dag


def _make_vcn_kernel(d, tiles_per_block, n_terms):
    E = d * (d - 1)

    def kernel(c_ref, s_ref, ll_ref, kl_ref, logp_ref):
        gibbs = c_ref[0]
        sparsity = c_ref[1]
        logp_const = c_ref[2]
        w = [c_ref[3 + e] for e in range(E)]           # per-edge Bernoulli log-prob weights
        sc = [c_ref[3 + E + e] for e in range(E)]      # per-edge score coefficients

        @pl.loop(0, tiles_per_block)
        def _(t):
            off = pl.multiple_of(t * _SUB, _SUB)
            # one (8,128) vreg per edge
            g = [s_ref[e, pl.ds(off, _SUB), :] for e in range(E)]

            # edge-vector statistics (full-vreg VPU work)
            edge_sum = g[0]
            logp = g[0] * w[0]
            ll = g[0] * sc[0]
            for e in range(1, E):
                edge_sum = edge_sum + g[e]
                logp = logp + g[e] * w[e]
                ll = ll + g[e] * sc[e]
            logp = logp + logp_const

            def G(i, j):
                return g[_edge_idx(i, j, d)]

            if d == 4:
                dag = _dagness_d4(G, n_terms)
            else:
                dag = _dagness_generic(G, d, n_terms)

            log_prior = -(gibbs * dag + sparsity * edge_sum)
            kl = logp - log_prior

            ll_ref[pl.ds(off, _SUB), :] = ll
            kl_ref[pl.ds(off, _SUB), :] = kl
            logp_ref[pl.ds(off, _SUB), :] = logp

    return kernel


def _plan_batch(B):
    """Return (total sublane rows R, tiles per grid block, grid size)."""
    tile = _SUB * _LANES                         # 1024 samples per (8,128) compute tile
    n_tiles = max(2, -(-B // tile))              # >= 2 grid blocks so both v7x TCs run
    if n_tiles >= 8:
        tpb = 4                                  # 4096 samples per grid block
    elif n_tiles >= 4:
        tpb = 2
    else:
        tpb = 1
    n_tiles = -(-n_tiles // tpb) * tpb
    return n_tiles * _SUB, tpb, n_tiles // tpb


def vcn_forward(samples, edge_logits, score_mat, gibbs_temp, sparsity_factor, num_nodes):
    d = num_nodes
    E = d * (d - 1)
    B, E_in = samples.shape
    assert E_in == E

    # ---- glue: batch onto (sublane, lane) tiles ----
    R, tpb, n_blocks = _plan_batch(B)
    B_pad = R * _LANES
    s_t = samples.astype(jnp.float32).T                            # (E, B)
    if B_pad > B:
        s_t = jnp.pad(s_t, ((0, 0), (0, B_pad - B)))               # zero-pad (discarded later)
    s3 = s_t.reshape(E, R, _LANES)

    # ---- glue: batch-invariant per-edge constants (hoisted out of the kernel) ----
    theta = edge_logits.astype(jnp.float32).reshape(E)
    log_sig_pos = jax.nn.log_sigmoid(theta)
    log_sig_neg = jax.nn.log_sigmoid(-theta)
    w = log_sig_pos - log_sig_neg
    logp_const = jnp.sum(log_sig_neg)

    idx_i = np.arange(E) // (d - 1)
    idx_j = (np.arange(E) % (d - 1) + 1 + idx_i) % d
    score_vec = jnp.asarray(score_mat, jnp.float32)[idx_i, idx_j]

    consts = jnp.concatenate([
        jnp.array([gibbs_temp, sparsity_factor], jnp.float32),
        jnp.reshape(logp_const, (1,)),
        w, score_vec])                                             # (2E + 3,)

    S_BLK = tpb * _SUB
    outs = pl.pallas_call(
        _make_vcn_kernel(d, tpb, _TAYLOR_TERMS),
        out_shape=tuple(jax.ShapeDtypeStruct((R, _LANES), jnp.float32) for _ in range(3)),
        grid=(n_blocks,),
        in_specs=[
            pl.BlockSpec(memory_space=pltpu.MemorySpace.SMEM),     # packed scalar constants
            pl.BlockSpec((E, S_BLK, _LANES), lambda b: (0, b, 0)),  # samples tiles
        ],
        out_specs=[pl.BlockSpec((S_BLK, _LANES), lambda b: (b, 0)) for _ in range(3)],
        compiler_params=pltpu.CompilerParams(
            dimension_semantics=("parallel",)),
    )(consts, s3)

    ll_p, kl_p, logp_p = outs
    return (ll_p.reshape(-1)[:B],
            kl_p.reshape(-1)[:B],
            logp_p.reshape(-1)[:B])


# ---------------------------------------------------------------------------
# Pure-JAX reference (roll-based adjacency construction, like vcn_utils)
# ---------------------------------------------------------------------------
def _vec_to_adj_mat_ref(vec, d):
    B = vec.shape[0]
    m = vec.reshape(B, d, d - 1)
    full = jnp.concatenate([jnp.zeros((B, d, 1), vec.dtype), m], axis=-1)
    rows = [jnp.roll(full[:, i, :], i, axis=-1) for i in range(d)]
    return jnp.stack(rows, axis=1)


def _reference(samples, edge_logits, score_mat, gibbs_temp, sparsity_factor, d):
    B, E = samples.shape
    G = _vec_to_adj_mat_ref(samples.astype(jnp.float32), d)
    eye = jnp.eye(d, dtype=jnp.float32)
    term = jnp.broadcast_to(eye, (B, d, d))
    acc = term
    for k in range(1, 31):
        term = jnp.einsum('bij,bjk->bik', term, G) / k
        acc = acc + term
    trace = jnp.trace(acc, axis1=-2, axis2=-1)
    dagness = trace - d
    edge_sum = jnp.sum(G, axis=(-1, -2))
    theta = edge_logits[None, :]
    logp = jnp.sum(samples * jax.nn.log_sigmoid(theta)
                   + (1.0 - samples) * jax.nn.log_sigmoid(-theta), axis=-1)
    ll = jnp.sum(G * score_mat[None, :, :], axis=(-1, -2))
    log_prior = -(gibbs_temp * dagness + sparsity_factor * edge_sum)
    kl = logp - log_prior
    return ll, kl, logp


if __name__ == "__main__":
    key = jax.random.PRNGKey(0)
    num_nodes = 4                       # VCN enumerates DAGs only for num_nodes <= 4
    E = num_nodes * (num_nodes - 1)     # 12 off-diagonal edges
    batch_size = 8                      # opt.batch_size (n_samples)
    gibbs_temp = 10.0                   # gibbs_temp_init; anneal disabled
    sparsity_factor = 1e-4

    k_logits, k_score, k_sample = jax.random.split(key, 3)

    # Deterministic "parameters" of the simplified graph posterior / scorer.
    edge_logits = jax.random.normal(k_logits, (E,), dtype=jnp.float32)
    score_mat = jax.random.normal(k_score, (num_nodes, num_nodes), dtype=jnp.float32)

    # Glue: sample binary edge vectors from the factorised posterior.
    edge_probs = jax.nn.sigmoid(edge_logits)
    samples = (jax.random.uniform(k_sample, (batch_size, E)) < edge_probs).astype(jnp.float32)

    log_likelihood, kl_graph, posterior_log_probs = vcn_forward(
        samples, edge_logits, score_mat, gibbs_temp, sparsity_factor, num_nodes)
    jax.block_until_ready((log_likelihood, kl_graph, posterior_log_probs))

    # Correctness check against pure-JAX reference.
    ll_ref, kl_ref, logp_ref = _reference(
        samples, edge_logits, score_mat, gibbs_temp, sparsity_factor, num_nodes)
    np.testing.assert_allclose(np.asarray(log_likelihood), np.asarray(ll_ref),
                               rtol=1e-4, atol=1e-4)
    np.testing.assert_allclose(np.asarray(kl_graph), np.asarray(kl_ref),
                               rtol=1e-4, atol=1e-4)
    np.testing.assert_allclose(np.asarray(posterior_log_probs), np.asarray(logp_ref),
                               rtol=1e-4, atol=1e-4)

    print("KERNEL_OK")
</pallas_src>

<mosaic_0001>
module attributes {stable_mosaic.version = 11 : i64} {
  func.func @kernel(%arg0: i32, %arg1: memref<27xf32, #tpu.memory_space<smem>>, %arg2: memref<12x8x128xf32, #tpu.memory_space<vmem>>, %arg3: memref<8x128xf32, #tpu.memory_space<vmem>>, %arg4: memref<8x128xf32, #tpu.memory_space<vmem>>, %arg5: memref<8x128xf32, #tpu.memory_space<vmem>>) attributes {dimension_semantics = [#tpu.dimension_semantics<parallel>], iteration_bounds = array<i64: 2>, scalar_prefetch = 0 : i64, scratch_operands = 0 : i64, tpu.core_type = #tpu.core_type<tc>, window_params = [{transform_indices = @transform_0, window_bounds = array<i64: 27>}, {transform_indices = @transform_1, window_bounds = array<i64: 12, 8, 128>}, {transform_indices = @transform_2, window_bounds = array<i64: 8, 128>}, {transform_indices = @transform_3, window_bounds = array<i64: 8, 128>}, {transform_indices = @transform_4, window_bounds = array<i64: 8, 128>}]} {
    %c0 = arith.constant 0 : index
    %0 = memref.load %arg1[%c0] : memref<27xf32, #tpu.memory_space<smem>>
    %c1 = arith.constant 1 : index
    %1 = memref.load %arg1[%c1] : memref<27xf32, #tpu.memory_space<smem>>
    %c2 = arith.constant 2 : index
    %2 = memref.load %arg1[%c2] : memref<27xf32, #tpu.memory_space<smem>>
    %c3 = arith.constant 3 : index
    %3 = memref.load %arg1[%c3] : memref<27xf32, #tpu.memory_space<smem>>
    %c4 = arith.constant 4 : index
    %4 = memref.load %arg1[%c4] : memref<27xf32, #tpu.memory_space<smem>>
    %c5 = arith.constant 5 : index
    %5 = memref.load %arg1[%c5] : memref<27xf32, #tpu.memory_space<smem>>
    %c6 = arith.constant 6 : index
    %6 = memref.load %arg1[%c6] : memref<27xf32, #tpu.memory_space<smem>>
    %c7 = arith.constant 7 : index
    %7 = memref.load %arg1[%c7] : memref<27xf32, #tpu.memory_space<smem>>
    %c8 = arith.constant 8 : index
    %8 = memref.load %arg1[%c8] : memref<27xf32, #tpu.memory_space<smem>>
    %c9 = arith.constant 9 : index
    %9 = memref.load %arg1[%c9] : memref<27xf32, #tpu.memory_space<smem>>
    %c10 = arith.constant 10 : index
    %10 = memref.load %arg1[%c10] : memref<27xf32, #tpu.memory_space<smem>>
    %c11 = arith.constant 11 : index
    %11 = memref.load %arg1[%c11] : memref<27xf32, #tpu.memory_space<smem>>
    %c12 = arith.constant 12 : index
    %12 = memref.load %arg1[%c12] : memref<27xf32, #tpu.memory_space<smem>>
    %c13 = arith.constant 13 : index
    %13 = memref.load %arg1[%c13] : memref<27xf32, #tpu.memory_space<smem>>
    %c14 = arith.constant 14 : index
    %14 = memref.load %arg1[%c14] : memref<27xf32, #tpu.memory_space<smem>>
    %c15 = arith.constant 15 : index
    %15 = memref.load %arg1[%c15] : memref<27xf32, #tpu.memory_space<smem>>
    %c16 = arith.constant 16 : index
    %16 = memref.load %arg1[%c16] : memref<27xf32, #tpu.memory_space<smem>>
    %c17 = arith.constant 17 : index
    %17 = memref.load %arg1[%c17] : memref<27xf32, #tpu.memory_space<smem>>
    %c18 = arith.constant 18 : index
    %18 = memref.load %arg1[%c18] : memref<27xf32, #tpu.memory_space<smem>>
    %c19 = arith.constant 19 : index
    %19 = memref.load %arg1[%c19] : memref<27xf32, #tpu.memory_space<smem>>
    %c20 = arith.constant 20 : index
    %20 = memref.load %arg1[%c20] : memref<27xf32, #tpu.memory_space<smem>>
    %c21 = arith.constant 21 : index
    %21 = memref.load %arg1[%c21] : memref<27xf32, #tpu.memory_space<smem>>
    %c22 = arith.constant 22 : index
    %22 = memref.load %arg1[%c22] : memref<27xf32, #tpu.memory_space<smem>>
    %c23 = arith.constant 23 : index
    %23 = memref.load %arg1[%c23] : memref<27xf32, #tpu.memory_space<smem>>
    %c24 = arith.constant 24 : index
    %24 = memref.load %arg1[%c24] : memref<27xf32, #tpu.memory_space<smem>>
    %c25 = arith.constant 25 : index
    %25 = memref.load %arg1[%c25] : memref<27xf32, #tpu.memory_space<smem>>
    %c26 = arith.constant 26 : index
    %26 = memref.load %arg1[%c26] : memref<27xf32, #tpu.memory_space<smem>>
    %c0_i32 = arith.constant 0 : i32
    %c1_i32 = arith.constant 1 : i32
    %27 = arith.muli %c0_i32, %c1_i32 : i32
    %c0_i32_0 = arith.constant 0 : i32
    %28 = arith.addi %c0_i32_0, %27 : i32
    %c8_i32 = arith.constant 8 : i32
    %29 = arith.muli %28, %c8_i32 : i32
    %30 = tpu.assume_multiple %29, 8 : i32
    %c0_1 = arith.constant 0 : index
    %31 = arith.index_cast %30 : i32 to index
    %c0_2 = arith.constant 0 : index
    %32 = vector.load %arg2[%c0_1, %31, %c0_2] : memref<12x8x128xf32, #tpu.memory_space<vmem>>, vector<1x8x128xf32>
    %33 = vector.shape_cast %32 : vector<1x8x128xf32> to vector<8x128xf32>
    %c1_3 = arith.constant 1 : index
    %34 = arith.index_cast %30 : i32 to index
    %c0_4 = arith.constant 0 : index
    %35 = vector.load %arg2[%c1_3, %34, %c0_4] : memref<12x8x128xf32, #tpu.memory_space<vmem>>, vector<1x8x128xf32>
    %36 = vector.shape_cast %35 : vector<1x8x128xf32> to vector<8x128xf32>
    %c2_5 = arith.constant 2 : index
    %37 = arith.index_cast %30 : i32 to index
    %c0_6 = arith.constant 0 : index
    %38 = vector.load %arg2[%c2_5, %37, %c0_6] : memref<12x8x128xf32, #tpu.memory_space<vmem>>, vector<1x8x128xf32>
    %39 = vector.shape_cast %38 : vector<1x8x128xf32> to vector<8x128xf32>
    %c3_7 = arith.constant 3 : index
    %40 = arith.index_cast %30 : i32 to index
    %c0_8 = arith.constant 0 : index
    %41 = vector.load %arg2[%c3_7, %40, %c0_8] : memref<12x8x128xf32, #tpu.memory_space<vmem>>, vector<1x8x128xf32>
    %42 = vector.shape_cast %41 : vector<1x8x128xf32> to vector<8x128xf32>
    %c4_9 = arith.constant 4 : index
    %43 = arith.index_cast %30 : i32 to index
    %c0_10 = arith.constant 0 : index
    %44 = vector.load %arg2[%c4_9, %43, %c0_10] : memref<12x8x128xf32, #tpu.memory_space<vmem>>, vector<1x8x128xf32>
    %45 = vector.shape_cast %44 : vector<1x8x128xf32> to vector<8x128xf32>
    %c5_11 = arith.constant 5 : index
    %46 = arith.index_cast %30 : i32 to index
    %c0_12 = arith.constant 0 : index
    %47 = vector.load %arg2[%c5_11, %46, %c0_12] : memref<12x8x128xf32, #tpu.memory_space<vmem>>, vector<1x8x128xf32>
    %48 = vector.shape_cast %47 : vector<1x8x128xf32> to vector<8x128xf32>
    %c6_13 = arith.constant 6 : index
    %49 = arith.index_cast %30 : i32 to index
    %c0_14 = arith.constant 0 : index
    %50 = vector.load %arg2[%c6_13, %49, %c0_14] : memref<12x8x128xf32, #tpu.memory_space<vmem>>, vector<1x8x128xf32>
    %51 = vector.shape_cast %50 : vector<1x8x128xf32> to vector<8x128xf32>
    %c7_15 = arith.constant 7 : index
    %52 = arith.index_cast %30 : i32 to index
    %c0_16 = arith.constant 0 : index
    %53 = vector.load %arg2[%c7_15, %52, %c0_16] : memref<12x8x128xf32, #tpu.memory_space<vmem>>, vector<1x8x128xf32>
    %54 = vector.shape_cast %53 : vector<1x8x128xf32> to vector<8x128xf32>
    %c8_17 = arith.constant 8 : index
    %55 = arith.index_cast %30 : i32 to index
    %c0_18 = arith.constant 0 : index
    %56 = vector.load %arg2[%c8_17, %55, %c0_18] : memref<12x8x128xf32, #tpu.memory_space<vmem>>, vector<1x8x128xf32>
    %57 = vector.shape_cast %56 : vector<1x8x128xf32> to vector<8x128xf32>
    %c9_19 = arith.constant 9 : index
    %58 = arith.index_cast %30 : i32 to index
    %c0_20 = arith.constant 0 : index
    %59 = vector.load %arg2[%c9_19, %58, %c0_20] : memref<12x8x128xf32, #tpu.memory_space<vmem>>, vector<1x8x128xf32>
    %60 = vector.shape_cast %59 : vector<1x8x128xf32> to vector<8x128xf32>
    %c10_21 = arith.constant 10 : index
    %61 = arith.index_cast %30 : i32 to index
    %c0_22 = arith.constant 0 : index
    %62 = vector.load %arg2[%c10_21, %61, %c0_22] : memref<12x8x128xf32, #tpu.memory_space<vmem>>, vector<1x8x128xf32>
    %63 = vector.shape_cast %62 : vector<1x8x128xf32> to vector<8x128xf32>
    %c11_23 = arith.constant 11 : index
    %64 = arith.index_cast %30 : i32 to index
    %c0_24 = arith.constant 0 : index
    %65 = vector.load %arg2[%c11_23, %64, %c0_24] : memref<12x8x128xf32, #tpu.memory_space<vmem>>, vector<1x8x128xf32>
    %66 = vector.shape_cast %65 : vector<1x8x128xf32> to vector<8x128xf32>
    %67 = vector.broadcast %3 : f32 to vector<8x128xf32>
    %68 = arith.mulf %33, %67 : vector<8x128xf32>
    %69 = vector.broadcast %15 : f32 to vector<8x128xf32>
    %70 = arith.mulf %33, %69 : vector<8x128xf32>
    %71 = arith.addf %33, %36 : vector<8x128xf32>
    %72 = vector.broadcast %4 : f32 to vector<8x128xf32>
    %73 = arith.mulf %36, %72 : vector<8x128xf32>
    %74 = arith.addf %68, %73 : vector<8x128xf32>
    %75 = vector.broadcast %16 : f32 to vector<8x128xf32>
    %76 = arith.mulf %36, %75 : vector<8x128xf32>
    %77 = arith.addf %70, %76 : vector<8x128xf32>
    %78 = arith.addf %71, %39 : vector<8x128xf32>
    %79 = vector.broadcast %5 : f32 to vector<8x128xf32>
    %80 = arith.mulf %39, %79 : vector<8x128xf32>
    %81 = arith.addf %74, %80 : vector<8x128xf32>
    %82 = vector.broadcast %17 : f32 to vector<8x128xf32>
    %83 = arith.mulf %39, %82 : vector<8x128xf32>
    %84 = arith.addf %77, %83 : vector<8x128xf32>
    %85 = arith.addf %78, %42 : vector<8x128xf32>
    %86 = vector.broadcast %6 : f32 to vector<8x128xf32>
    %87 = arith.mulf %42, %86 : vector<8x128xf32>
    %88 = arith.addf %81, %87 : vector<8x128xf32>
    %89 = vector.broadcast %18 : f32 to vector<8x128xf32>
    %90 = arith.mulf %42, %89 : vector<8x128xf32>
    %91 = arith.addf %84, %90 : vector<8x128xf32>
    %92 = arith.addf %85, %45 : vector<8x128xf32>
    %93 = vector.broadcast %7 : f32 to vector<8x128xf32>
    %94 = arith.mulf %45, %93 : vector<8x128xf32>
    %95 = arith.addf %88, %94 : vector<8x128xf32>
    %96 = vector.broadcast %19 : f32 to vector<8x128xf32>
    %97 = arith.mulf %45, %96 : vector<8x128xf32>
    %98 = arith.addf %91, %97 : vector<8x128xf32>
    %99 = arith.addf %92, %48 : vector<8x128xf32>
    %100 = vector.broadcast %8 : f32 to vector<8x128xf32>
    %101 = arith.mulf %48, %100 : vector<8x128xf32>
    %102 = arith.addf %95, %101 : vector<8x128xf32>
    %103 = vector.broadcast %20 : f32 to vector<8x128xf32>
    %104 = arith.mulf %48, %103 : vector<8x128xf32>
    %105 = arith.addf %98, %104 : vector<8x128xf32>
    %106 = arith.addf %99, %51 : vector<8x128xf32>
    %107 = vector.broadcast %9 : f32 to vector<8x128xf32>
    %108 = arith.mulf %51, %107 : vector<8x128xf32>
    %109 = arith.addf %102, %108 : vector<8x128xf32>
    %110 = vector.broadcast %21 : f32 to vector<8x128xf32>
    %111 = arith.mulf %51, %110 : vector<8x128xf32>
    %112 = arith.addf %105, %111 : vector<8x128xf32>
    %113 = arith.addf %106, %54 : vector<8x128xf32>
    %114 = vector.broadcast %10 : f32 to vector<8x128xf32>
    %115 = arith.mulf %54, %114 : vector<8x128xf32>
    %116 = arith.addf %109, %115 : vector<8x128xf32>
    %117 = vector.broadcast %22 : f32 to vector<8x128xf32>
    %118 = arith.mulf %54, %117 : vector<8x128xf32>
    %119 = arith.addf %112, %118 : vector<8x128xf32>
    %120 = arith.addf %113, %57 : vector<8x128xf32>
    %121 = vector.broadcast %11 : f32 to vector<8x128xf32>
    %122 = arith.mulf %57, %121 : vector<8x128xf32>
    %123 = arith.addf %116, %122 : vector<8x128xf32>
    %124 = vector.broadcast %23 : f32 to vector<8x128xf32>
    %125 = arith.mulf %57, %124 : vector<8x128xf32>
    %126 = arith.addf %119, %125 : vector<8x128xf32>
    %127 = arith.addf %120, %60 : vector<8x128xf32>
    %128 = vector.broadcast %12 : f32 to vector<8x128xf32>
    %129 = arith.mulf %60, %128 : vector<8x128xf32>
    %130 = arith.addf %123, %129 : vector<8x128xf32>
    %131 = vector.broadcast %24 : f32 to vector<8x128xf32>
    %132 = arith.mulf %60, %131 : vector<8x128xf32>
    %133 = arith.addf %126, %132 : vector<8x128xf32>
    %134 = arith.addf %127, %63 : vector<8x128xf32>
    %135 = vector.broadcast %13 : f32 to vector<8x128xf32>
    %136 = arith.mulf %63, %135 : vector<8x128xf32>
    %137 = arith.addf %130, %136 : vector<8x128xf32>
    %138 = vector.broadcast %25 : f32 to vector<8x128xf32>
    %139 = arith.mulf %63, %138 : vector<8x128xf32>
    %140 = arith.addf %133, %139 : vector<8x128xf32>
    %141 = arith.addf %134, %66 : vector<8x128xf32>
    %142 = vector.broadcast %14 : f32 to vector<8x128xf32>
    %143 = arith.mulf %66, %142 : vector<8x128xf32>
    %144 = arith.addf %137, %143 : vector<8x128xf32>
    %145 = vector.broadcast %26 : f32 to vector<8x128xf32>
    %146 = arith.mulf %66, %145 : vector<8x128xf32>
    %147 = arith.addf %140, %146 : vector<8x128xf32>
    %148 = vector.broadcast %2 : f32 to vector<8x128xf32>
    %149 = arith.addf %144, %148 : vector<8x128xf32>
    %150 = arith.mulf %33, %48 : vector<8x128xf32>
    %151 = arith.mulf %36, %54 : vector<8x128xf32>
    %152 = arith.addf %150, %151 : vector<8x128xf32>
    %153 = arith.mulf %39, %60 : vector<8x128xf32>
    %154 = arith.addf %152, %153 : vector<8x128xf32>
    %155 = arith.mulf %36, %57 : vector<8x128xf32>
    %156 = arith.mulf %39, %63 : vector<8x128xf32>
    %157 = arith.addf %155, %156 : vector<8x128xf32>
    %158 = arith.mulf %33, %42 : vector<8x128xf32>
    %159 = arith.mulf %39, %66 : vector<8x128xf32>
    %160 = arith.addf %158, %159 : vector<8x128xf32>
    %161 = arith.mulf %33, %45 : vector<8x128xf32>
    %162 = arith.mulf %36, %51 : vector<8x128xf32>
    %163 = arith.addf %161, %162 : vector<8x128xf32>
    %164 = arith.mulf %42, %54 : vector<8x128xf32>
    %165 = arith.mulf %45, %60 : vector<8x128xf32>
    %166 = arith.addf %164, %165 : vector<8x128xf32>
    %167 = arith.mulf %48, %33 : vector<8x128xf32>
    %168 = arith.mulf %42, %57 : vector<8x128xf32>
    %169 = arith.addf %167, %168 : vector<8x128xf32>
    %170 = arith.mulf %45, %63 : vector<8x128xf32>
    %171 = arith.addf %169, %170 : vector<8x128xf32>
    %172 = arith.mulf %48, %36 : vector<8x128xf32>
    %173 = arith.mulf %45, %66 : vector<8x128xf32>
    %174 = arith.addf %172, %173 : vector<8x128xf32>
    %175 = arith.mulf %48, %39 : vector<8x128xf32>
    %176 = arith.mulf %42, %51 : vector<8x128xf32>
    %177 = arith.addf %175, %176 : vector<8x128xf32>
    %178 = arith.mulf %57, %48 : vector<8x128xf32>
    %179 = arith.mulf %51, %60 : vector<8x128xf32>
    %180 = arith.addf %178, %179 : vector<8x128xf32>
    %181 = arith.mulf %54, %33 : vector<8x128xf32>
    %182 = arith.mulf %51, %63 : vector<8x128xf32>
    %183 = arith.addf %181, %182 : vector<8x128xf32>
    %184 = arith.mulf %54, %36 : vector<8x128xf32>
    %185 = arith.mulf %57, %42 : vector<8x128xf32>
    %186 = arith.addf %184, %185 : vector<8x128xf32>
    %187 = arith.mulf %51, %66 : vector<8x128xf32>
    %188 = arith.addf %186, %187 : vector<8x128xf32>
    %189 = arith.mulf %54, %39 : vector<8x128xf32>
    %190 = arith.mulf %57, %45 : vector<8x128xf32>
    %191 = arith.addf %189, %190 : vector<8x128xf32>
    %192 = arith.mulf %63, %48 : vector<8x128xf32>
    %193 = arith.mulf %66, %54 : vector<8x128xf32>
    %194 = arith.addf %192, %193 : vector<8x128xf32>
    %195 = arith.mulf %60, %33 : vector<8x128xf32>
    %196 = arith.mulf %66, %57 : vector<8x128xf32>
    %197 = arith.addf %195, %196 : vector<8x128xf32>
    %198 = arith.mulf %60, %36 : vector<8x128xf32>
    %199 = arith.mulf %63, %42 : vector<8x128xf32>
    %200 = arith.addf %198, %199 : vector<8x128xf32>
    %201 = arith.mulf %60, %39 : vector<8x128xf32>
    %202 = arith.mulf %63, %45 : vector<8x128xf32>
    %203 = arith.addf %201, %202 : vector<8x128xf32>
    %204 = arith.mulf %66, %51 : vector<8x128xf32>
    %205 = arith.addf %203, %204 : vector<8x128xf32>
    %206 = arith.addf %154, %171 : vector<8x128xf32>
    %207 = arith.addf %206, %188 : vector<8x128xf32>
    %208 = arith.addf %207, %205 : vector<8x128xf32>
    %209 = arith.mulf %154, %154 : vector<8x128xf32>
    %210 = arith.mulf %171, %171 : vector<8x128xf32>
    %211 = arith.addf %209, %210 : vector<8x128xf32>
    %212 = arith.mulf %188, %188 : vector<8x128xf32>
    %213 = arith.addf %211, %212 : vector<8x128xf32>
    %214 = arith.mulf %205, %205 : vector<8x128xf32>
    %215 = arith.addf %213, %214 : vector<8x128xf32>
    %216 = arith.mulf %157, %48 : vector<8x128xf32>
    %217 = arith.mulf %157, %166 : vector<8x128xf32>
    %218 = arith.addf %215, %217 : vector<8x128xf32>
    %219 = arith.mulf %160, %54 : vector<8x128xf32>
    %220 = arith.addf %216, %219 : vector<8x128xf32>
    %221 = arith.mulf %160, %180 : vector<8x128xf32>
    %222 = arith.addf %218, %221 : vector<8x128xf32>
    %223 = arith.mulf %163, %60 : vector<8x128xf32>
    %224 = arith.addf %220, %223 : vector<8x128xf32>
    %225 = arith.mulf %163, %194 : vector<8x128xf32>
    %226 = arith.addf %222, %225 : vector<8x128xf32>
    %227 = arith.mulf %166, %33 : vector<8x128xf32>
    %228 = arith.addf %224, %227 : vector<8x128xf32>
    %229 = arith.mulf %166, %157 : vector<8x128xf32>
    %230 = arith.addf %226, %229 : vector<8x128xf32>
    %231 = arith.mulf %174, %57 : vector<8x128xf32>
    %232 = arith.addf %228, %231 : vector<8x128xf32>
    %233 = arith.mulf %174, %183 : vector<8x128xf32>
    %234 = arith.addf %230, %233 : vector<8x128xf32>
    %235 = arith.mulf %177, %63 : vector<8x128xf32>
    %236 = arith.addf %232, %235 : vector<8x128xf32>
    %237 = arith.mulf %177, %197 : vector<8x128xf32>
    %238 = arith.addf %234, %237 : vector<8x128xf32>
    %239 = arith.mulf %180, %36 : vector<8x128xf32>
    %240 = arith.addf %236, %239 : vector<8x128xf32>
    %241 = arith.mulf %180, %160 : vector<8x128xf32>
    %242 = arith.addf %238, %241 : vector<8x128xf32>
    %243 = arith.mulf %183, %42 : vector<8x128xf32>
    %244 = arith.addf %240, %243 : vector<8x128xf32>
    %245 = arith.mulf %183, %174 : vector<8x128xf32>
    %246 = arith.addf %242, %245 : vector<8x128xf32>
    %247 = arith.mulf %191, %66 : vector<8x128xf32>
    %248 = arith.addf %244, %247 : vector<8x128xf32>
    %249 = arith.mulf %191, %200 : vector<8x128xf32>
    %250 = arith.addf %246, %249 : vector<8x128xf32>
    %251 = arith.mulf %194, %39 : vector<8x128xf32>
    %252 = arith.addf %248, %251 : vector<8x128xf32>
    %253 = arith.mulf %194, %163 : vector<8x128xf32>
    %254 = arith.addf %250, %253 : vector<8x128xf32>
    %255 = arith.mulf %197, %45 : vector<8x128xf32>
    %256 = arith.addf %252, %255 : vector<8x128xf32>
    %257 = arith.mulf %197, %177 : vector<8x128xf32>
    %258 = arith.addf %254, %257 : vector<8x128xf32>
    %259 = arith.mulf %200, %51 : vector<8x128xf32>
    %260 = arith.addf %256, %259 : vector<8x128xf32>
    %261 = arith.mulf %200, %191 : vector<8x128xf32>
    %262 = arith.addf %258, %261 : vector<8x128xf32>
    %cst = arith.constant 5.000000e-01 : f32
    %263 = vector.broadcast %cst : f32 to vector<8x128xf32>
    %264 = arith.mulf %208, %263 : vector<8x128xf32>
    %cst_25 = arith.constant 0.333333343 : f32
    %265 = vector.broadcast %cst_25 : f32 to vector<8x128xf32>
    %266 = arith.mulf %260, %265 : vector<8x128xf32>
    %267 = arith.mulf %208, %208 : vector<8x128xf32>
    %cst_26 = arith.constant 5.000000e-01 : f32
    %268 = vector.broadcast %cst_26 : f32 to vector<8x128xf32>
    %269 = arith.mulf %267, %268 : vector<8x128xf32>
    %270 = arith.subf %262, %269 : vector<8x128xf32>
    %cst_27 = arith.constant 2.500000e-01 : f32
    %271 = vector.broadcast %cst_27 : f32 to vector<8x128xf32>
    %272 = arith.mulf %270, %271 : vector<8x128xf32>
    %cst_28 = arith.constant 5.000000e-01 : f32
    %273 = vector.broadcast %cst_28 : f32 to vector<8x128xf32>
    %274 = arith.mulf %208, %273 : vector<8x128xf32>
    %cst_29 = arith.constant 0.166666672 : f32
    %275 = vector.broadcast %cst_29 : f32 to vector<8x128xf32>
    %276 = arith.mulf %260, %275 : vector<8x128xf32>
    %277 = arith.addf %274, %276 : vector<8x128xf32>
    %cst_30 = arith.constant 0.0416666679 : f32
    %278 = vector.broadcast %cst_30 : f32 to vector<8x128xf32>
    %279 = arith.mulf %262, %278 : vector<8x128xf32>
    %280 = arith.addf %277, %279 : vector<8x128xf32>
    %281 = arith.mulf %264, %260 : vector<8x128xf32>
    %282 = arith.mulf %266, %208 : vector<8x128xf32>
    %283 = arith.addf %281, %282 : vector<8x128xf32>
    %cst_31 = arith.constant 0.00833333377 : f32
    %284 = vector.broadcast %cst_31 : f32 to vector<8x128xf32>
    %285 = arith.mulf %283, %284 : vector<8x128xf32>
    %286 = arith.addf %280, %285 : vector<8x128xf32>
    %287 = arith.mulf %264, %262 : vector<8x128xf32>
    %288 = arith.mulf %266, %260 : vector<8x128xf32>
    %289 = arith.addf %287, %288 : vector<8x128xf32>
    %290 = arith.mulf %272, %208 : vector<8x128xf32>
    %291 = arith.addf %289, %290 : vector<8x128xf32>
    %cst_32 = arith.constant 0.00138888892 : f32
    %292 = vector.broadcast %cst_32 : f32 to vector<8x128xf32>
    %293 = arith.mulf %291, %292 : vector<8x128xf32>
    %294 = arith.addf %286, %293 : vector<8x128xf32>
    %295 = arith.mulf %264, %283 : vector<8x128xf32>
    %296 = arith.mulf %266, %262 : vector<8x128xf32>
    %297 = arith.addf %295, %296 : vector<8x128xf32>
    %298 = arith.mulf %272, %260 : vector<8x128xf32>
    %299 = arith.addf %297, %298 : vector<8x128xf32>
    %cst_33 = arith.constant 1.98412701E-4 : f32
    %300 = vector.broadcast %cst_33 : f32 to vector<8x128xf32>
    %301 = arith.mulf %299, %300 : vector<8x128xf32>
    %302 = arith.addf %294, %301 : vector<8x128xf32>
    %303 = arith.mulf %264, %291 : vector<8x128xf32>
    %304 = arith.mulf %266, %283 : vector<8x128xf32>
    %305 = arith.addf %303, %304 : vector<8x128xf32>
    %306 = arith.mulf %272, %262 : vector<8x128xf32>
    %307 = arith.addf %305, %306 : vector<8x128xf32>
    %cst_34 = arith.constant 2.48015876E-5 : f32
    %308 = vector.broadcast %cst_34 : f32 to vector<8x128xf32>
    %309 = arith.mulf %307, %308 : vector<8x128xf32>
    %310 = arith.addf %302, %309 : vector<8x128xf32>
    %311 = arith.mulf %264, %299 : vector<8x128xf32>
    %312 = arith.mulf %266, %291 : vector<8x128xf32>
    %313 = arith.addf %311, %312 : vector<8x128xf32>
    %314 = arith.mulf %272, %283 : vector<8x128xf32>
    %315 = arith.addf %313, %314 : vector<8x128xf32>
    %cst_35 = arith.constant 2.75573188E-6 : f32
    %316 = vector.broadcast %cst_35 : f32 to vector<8x128xf32>
    %317 = arith.mulf %315, %316 : vector<8x128xf32>
    %318 = arith.addf %310, %317 : vector<8x128xf32>
    %319 = arith.mulf %264, %307 : vector<8x128xf32>
    %320 = arith.mulf %266, %299 : vector<8x128xf32>
    %321 = arith.addf %319, %320 : vector<8x128xf32>
    %322 = arith.mulf %272, %291 : vector<8x128xf32>
    %323 = arith.addf %321, %322 : vector<8x128xf32>
    %cst_36 = arith.constant 2.755732E-7 : f32
    %324 = vector.broadcast %cst_36 : f32 to vector<8x128xf32>
    %325 = arith.mulf %323, %324 : vector<8x128xf32>
    %326 = arith.addf %318, %325 : vector<8x128xf32>
    %327 = arith.mulf %264, %315 : vector<8x128xf32>
    %328 = arith.mulf %266, %307 : vector<8x128xf32>
    %329 = arith.addf %327, %328 : vector<8x128xf32>
    %330 = arith.mulf %272, %299 : vector<8x128xf32>
    %331 = arith.addf %329, %330 : vector<8x128xf32>
    %cst_37 = arith.constant 2.50521079E-8 : f32
    %332 = vector.broadcast %cst_37 : f32 to vector<8x128xf32>
    %333 = arith.mulf %331, %332 : vector<8x128xf32>
    %334 = arith.addf %326, %333 : vector<8x128xf32>
    %335 = arith.mulf %264, %323 : vector<8x128xf32>
    %336 = arith.mulf %266, %315 : vector<8x128xf32>
    %337 = arith.addf %335, %336 : vector<8x128xf32>
    %338 = arith.mulf %272, %307 : vector<8x128xf32>
    %339 = arith.addf %337, %338 : vector<8x128xf32>
    %cst_38 = arith.constant 2.08767559E-9 : f32
    %340 = vector.broadcast %cst_38 : f32 to vector<8x128xf32>
    %341 = arith.mulf %339, %340 : vector<8x128xf32>
    %342 = arith.addf %334, %341 : vector<8x128xf32>
    %343 = arith.mulf %264, %331 : vector<8x128xf32>
    %344 = arith.mulf %266, %323 : vector<8x128xf32>
    %345 = arith.addf %343, %344 : vector<8x128xf32>
    %346 = arith.mulf %272, %315 : vector<8x128xf32>
    %347 = arith.addf %345, %346 : vector<8x128xf32>
    %cst_39 = arith.constant 1.60590444E-10 : f32
    %348 = vector.broadcast %cst_39 : f32 to vector<8x128xf32>
    %349 = arith.mulf %347, %348 : vector<8x128xf32>
    %350 = arith.addf %342, %349 : vector<8x128xf32>
    %351 = arith.mulf %264, %339 : vector<8x128xf32>
    %352 = arith.mulf %266, %331 : vector<8x128xf32>
    %353 = arith.addf %351, %352 : vector<8x128xf32>
    %354 = arith.mulf %272, %323 : vector<8x128xf32>
    %355 = arith.addf %353, %354 : vector<8x128xf32>
    %cst_40 = arith.constant 1.14707454E-11 : f32
    %356 = vector.broadcast %cst_40 : f32 to vector<8x128xf32>
    %357 = arith.mulf %355, %356 : vector<8x128xf32>
    %358 = arith.addf %350, %357 : vector<8x128xf32>
    %359 = arith.mulf %264, %347 : vector<8x128xf32>
    %360 = arith.mulf %266, %339 : vector<8x128xf32>
    %361 = arith.addf %359, %360 : vector<8x128xf32>
    %362 = arith.mulf %272, %331 : vector<8x128xf32>
    %363 = arith.addf %361, %362 : vector<8x128xf32>
    %cst_41 = arith.constant 7.6471636E-13 : f32
    %364 = vector.broadcast %cst_41 : f32 to vector<8x128xf32>
    %365 = arith.mulf %363, %364 : vector<8x128xf32>
    %366 = arith.addf %358, %365 : vector<8x128xf32>
    %367 = arith.mulf %264, %355 : vector<8x128xf32>
    %368 = arith.mulf %266, %347 : vector<8x128xf32>
    %369 = arith.addf %367, %368 : vector<8x128xf32>
    %370 = arith.mulf %272, %339 : vector<8x128xf32>
    %371 = arith.addf %369, %370 : vector<8x128xf32>
    %cst_42 = arith.constant 4.77947726E-14 : f32
    %372 = vector.broadcast %cst_42 : f32 to vector<8x128xf32>
    %373 = arith.mulf %371, %372 : vector<8x128xf32>
    %374 = arith.addf %366, %373 : vector<8x128xf32>
    %375 = arith.mulf %264, %363 : vector<8x128xf32>
    %376 = arith.mulf %266, %355 : vector<8x128xf32>
    %377 = arith.addf %375, %376 : vector<8x128xf32>
    %378 = arith.mulf %272, %347 : vector<8x128xf32>
    %379 = arith.addf %377, %378 : vector<8x128xf32>
    %cst_43 = arith.constant 2.81145736E-15 : f32
    %380 = vector.broadcast %cst_43 : f32 to vector<8x128xf32>
    %381 = arith.mulf %379, %380 : vector<8x128xf32>
    %382 = arith.addf %374, %381 : vector<8x128xf32>
    %383 = arith.mulf %264, %371 : vector<8x128xf32>
    %384 = arith.mulf %266, %363 : vector<8x128xf32>
    %385 = arith.addf %383, %384 : vector<8x128xf32>
    %386 = arith.mulf %272, %355 : vector<8x128xf32>
    %387 = arith.addf %385, %386 : vector<8x128xf32>
    %cst_44 = arith.constant 1.56192068E-16 : f32
    %388 = vector.broadcast %cst_44 : f32 to vector<8x128xf32>
    %389 = arith.mulf %387, %388 : vector<8x128xf32>
    %390 = arith.addf %382, %389 : vector<8x128xf32>
    %391 = arith.mulf %264, %379 : vector<8x128xf32>
    %392 = arith.mulf %266, %371 : vector<8x128xf32>
    %393 = arith.addf %391, %392 : vector<8x128xf32>
    %394 = arith.mulf %272, %363 : vector<8x128xf32>
    %395 = arith.addf %393, %394 : vector<8x128xf32>
    %cst_45 = arith.constant 8.22063508E-18 : f32
    %396 = vector.broadcast %cst_45 : f32 to vector<8x128xf32>
    %397 = arith.mulf %395, %396 : vector<8x128xf32>
    %398 = arith.addf %390, %397 : vector<8x128xf32>
    %399 = arith.mulf %264, %387 : vector<8x128xf32>
    %400 = arith.mulf %266, %379 : vector<8x128xf32>
    %401 = arith.addf %399, %400 : vector<8x128xf32>
    %402 = arith.mulf %272, %371 : vector<8x128xf32>
    %403 = arith.addf %401, %402 : vector<8x128xf32>
    %cst_46 = arith.constant 4.11031759E-19 : f32
    %404 = vector.broadcast %cst_46 : f32 to vector<8x128xf32>
    %405 = arith.mulf %403, %404 : vector<8x128xf32>
    %406 = arith.addf %398, %405 : vector<8x128xf32>
    %407 = vector.broadcast %0 : f32 to vector<8x128xf32>
    %408 = arith.mulf %407, %406 : vector<8x128xf32>
    %409 = vector.broadcast %1 : f32 to vector<8x128xf32>
    %410 = arith.mulf %409, %141 : vector<8x128xf32>
    %411 = arith.addf %408, %410 : vector<8x128xf32>
    %cst_47 = arith.constant 0.000000e+00 : f32
    %412 = vector.broadcast %cst_47 : f32 to vector<8x128xf32>
    %413 = arith.subf %412, %411 : vector<8x128xf32>
    %414 = arith.subf %149, %413 : vector<8x128xf32>
    %415 = arith.index_cast %30 : i32 to index
    %c0_48 = arith.constant 0 : index
    %416 = vector.load %arg3[%415, %c0_48] : memref<8x128xf32, #tpu.memory_space<vmem>>, vector<8x128xf32>
    tpu.vector_store %arg3[%415, %c0_48], %147 {strides = array<i32>} : memref<8x128xf32, #tpu.memory_space<vmem>>, vector<8x128xf32>,
    %417 = arith.index_cast %30 : i32 to index
    %c0_49 = arith.constant 0 : index
    %418 = vector.load %arg4[%417, %c0_49] : memref<8x128xf32, #tpu.memory_space<vmem>>, vector<8x128xf32>
    tpu.vector_store %arg4[%417, %c0_49], %414 {strides = array<i32>} : memref<8x128xf32, #tpu.memory_space<vmem>>, vector<8x128xf32>,
    %419 = arith.index_cast %30 : i32 to index
    %c0_50 = arith.constant 0 : index
    %420 = vector.load %arg5[%419, %c0_50] : memref<8x128xf32, #tpu.memory_space<vmem>>, vector<8x128xf32>
    tpu.vector_store %arg5[%419, %c0_50], %149 {strides = array<i32>} : memref<8x128xf32, #tpu.memory_space<vmem>>, vector<8x128xf32>,
    %c1_i32_51 = arith.constant 1 : i32
    return
  }
  func.func @transform_0(%arg0: i32) -> i32 {
    %c0_i32 = arith.constant 0 : i32
    %c0_i32_0 = arith.constant 0 : i32
    return %c0_i32 : i32
  }
  func.func @transform_1(%arg0: i32) -> (i32, i32, i32) {
    %c0_i32 = arith.constant 0 : i32
    %c0_i32_0 = arith.constant 0 : i32
    %c0_i32_1 = arith.constant 0 : i32
    return %c0_i32, %arg0, %c0_i32_0 : i32, i32, i32
  }
  func.func @transform_2(%arg0: i32) -> (i32, i32) {
    %c0_i32 = arith.constant 0 : i32
    %c0_i32_0 = arith.constant 0 : i32
    return %arg0, %c0_i32 : i32, i32
  }
  func.func @transform_3(%arg0: i32) -> (i32, i32) {
    %c0_i32 = arith.constant 0 : i32
    %c0_i32_0 = arith.constant 0 : i32
    return %arg0, %c0_i32 : i32, i32
  }
  func.func @transform_4(%arg0: i32) -> (i32, i32) {
    %c0_i32 = arith.constant 0 : i32
    %c0_i32_0 = arith.constant 0 : i32
    return %arg0, %c0_i32 : i32, i32
  }
}

</mosaic_0001>

<bundles_post_ra>
// kernel: tpu_custom_call.1
= control target key start
LH: loop header
LB: loop body
LE: loop exit
PB: predicated region body
PF: predicated region fallthrough
CT: control target
= control target key end

     0   :  { %10 = vsyncpa [#allocation5], 0  ;;  %s1718_s0 = inlined_call_operand.hbm [shape: f32[27], index: 0, kind: input, shape index: {}]   ;;  %s1719_s1 = inlined_call_operand.hbm [shape: f32[12,16,128], index: 1, kind: input, shape index: {}]   ;;  %s1720_s2 = inlined_call_operand.hbm [shape: f32[16,128], index: 2, kind: output, shape index: {0}]   ;;  %s1721_s3 = inlined_call_operand.hbm [shape: f32[16,128], index: 3, kind: output, shape index: {1}]   ;;  %s1722_s4 = inlined_call_operand.hbm [shape: f32[16,128], index: 4, kind: output, shape index: {2}]  }
   0x1   :  { %11 = vsyncpa [#allocation3], 0 }
   0x2   :  { %13 = vsyncpa [#allocation3 + $0x1], 0 }
   0x3   :  { %14 = vsyncpa [#allocation4], 0 }
   0x4   :  { %16 = vsyncpa [#allocation4 + $0x1], 0 }
   0x5   :  { %17 = vsyncpa [#allocation9], 0 }
   0x6   :  { %19 = vsyncpa [#allocation9 + $0x1], 0  ;;  %s1149_s15 = smov 0   ;;  %s1151_s16 = smov 0  }
   0x7   :  { %s1153_s17 = smov 0   ;;  %s1155_s18 = smov 0  }
   0x8 LB: > { %s1170_s19 = sadd.s32 4294967295, %s1114_s18   ;;  %s824_s20 = sadd.s32 4294967294, %s1114_s18   ;;  %s1114_s18 = sphi %s1155_s18, %s1744_s18   ;;  %s1110_s17 = sphi %s1153_s17, %s1743_s17   ;;  %s1106_s16 = sphi %s1151_s16, %s1742_s16   ;;  %s1102_s15 = sphi %s1149_s15, %s1741_s15  }
   0x9   : > { %s1174_s21 = sadd.s32 1, %s1114_s18   ;;  %s53_s22 = sadd.s32 1, %s1110_s17 }
   0xa   : > { %s50_s23 = ssub.s32 %s1114_s18, %s1174_s21  ;;  %p60_p0 = scmp.ne.s32.totalorder %s1110_s17, %s1106_s16 }
   0xb   : > { %p51_p1 = scmp.eq.s32.totalorder %s50_s23, 0  ;;  %p61_p2 = scmp.eq.s32.totalorder %s1114_s18, 0 }
   0xc   : > { %p66_p3 = scmp.ne.s32.totalorder %s1106_s16, %s1102_s15  ;;  %p1723_p4 = scmp.eq.s32.totalorder %s1170_s19, 0 }
   0xd   : > { %s1186_s24 = scalar_select %p51_p1, %s1110_s17, %s53_s22  }
   0xe   : > { %p1188_p5 = por %p61_p2, %p60_p0  ;;  %p1194_p6 = por %p1723_p4, %p66_p3 }
   0xf   : > { %p90_p7 = scmp.eq.s32.totalorder %s1170_s19, 1  ;;  %p96_p8 = scmp.eq.s32.totalorder %s824_s20, 1 }
  0x10   : > { %s1728_s26 = scalar_select %p1194_p6, 1, 0 }
  0x11   : > { %p825_p9 = scmp.ge.s32.totalorder %s1114_s18, 1  ;;  %p155_p10 = scmp.lt.s32.totalorder %s1114_s18, 3 }
  0x12   : > { %p1203_p11 = por %p90_p7, %p60_p0  ;;  %p1207_p12 = por %p96_p8, %p66_p3 }
  0x13   : > { %p1211_p13 = pnand %p825_p9, %p155_p10  ;;  %p912_p4 = scmp.lt.s32.totalorder %s1114_s18, 2 }
  0x14   : > { %s1729_s27 = scalar_select %p1203_p11, 1, 0 }
  0x15   : > { %s1730_s28 = scalar_select %p1207_p12, 1, 0 }
  0x16   : > { %s1731_s29 = scalar_select %p1211_p13, 1, 0 }
  0x17   : > { %p893_p2 = pneg %p1211_p13  ;;  %s177_s30 = sand.u32 1, %s1110_s17  }
  0x18   : > { %s828_s5 = sshll.u32 %s1114_s18, 7  ;;  %p1732_p6 = scmp.eq.s32.totalorder %s1170_s19, 0 }
  0x19   : > { %p1225_p7 = pnand %p912_p4, %p1188_p5  ;;  %s879_s7 = smul.u32 96, %s177_s30 }
  0x1a   : > { %p894_p0 = pnand %p893_p2, %p1732_p6  ;;  %s1116_s8 = smov [#allocation2]  }
  0x1b   : > { %s1235_s13 = scalar_lea.hbm %s1719_s1, %s828_s5  ;;  %s181_s14 = scalar_lea.vmem [#allocation6], %s879_s7 }
  0x1c   : > { %896 = dma.hbm_to_smem (!%p894_p0), %s1718_s0, 16, %s1116_s8, [#allocation5]  }
  0x1d   : > { %s187_s22 = sshll.u32 %s181_s14, 4  ;;  %s1239_s23 = scalar_lea.sflag [#allocation3], %s177_s30  ;;  %s1237_s22 = int_to_ptr.vmem [resolvable:$true] %s187_s22 }
  0x1e   : > { %s962_s25 = scalar_lea.hbm %s1235_s13, 1536  ;;  %p964_p4 = pneg %p1225_p7 }
  0x1f   : > { %p963_p3 = scmp.ne.s32.totalorder %s1235_s13, %s962_s25  ;;  %s967_s5 = scalar_lea.hbm %s1719_s1, 3072 }
  0x20   : > { %p968_p8 = scmp.lt.s32.totalorder %s1235_s13, %s1719_s1  ;;  %p969_p9 = scmp.lt.s32.totalorder %s967_s5, %s962_s25 }
  0x21   : > { %p965_p5 = pnand %p964_p4, %p963_p3 }
  0x22   : > { %p970_p10 = por %p969_p9, %p968_p8 }
  0x23   : > { %p966_p6 = pneg %p965_p5 }
  0x25   : > { %p971_p2 = pnand %p970_p10, %p966_p6 }
  0x27   : > { %974 = shalt.err (!%p971_p2)
}
  0x28   : > { %s975_s30 = scalar_lea.vmem %s1237_s22, 1536  ;;  %s1117_s7 = smov [#allocation6]  }
  0x29   : > { %p976_p0 = scmp.ne.s32.totalorder %s1237_s22, %s975_s30  ;;  %s980_s12 = sshll.u32 %s1117_s7, 4  ;;  %s981_s12 = int_to_ptr.vmem [resolvable:$false] %s980_s12 }
  0x2a   : > { %s982_s14 = scalar_lea.vmem %s981_s12, 3072  ;;  %p983_p5 = scmp.lt.s32.totalorder %s1237_s22, %s981_s12 }
  0x2b   : > { %p978_p1 = pnand %p976_p0, %p964_p4  ;;  %p984_p12 = scmp.lt.s32.totalorder %s982_s14, %s975_s30 }
  0x2d   : > { %p979_p3 = pneg %p978_p1  ;;  %p985_p11 = por %p984_p12, %p983_p5 }
  0x2f   : > { %p986_p13 = pnand %p985_p11, %p979_p3 }
  0x31   : > { %989 = shalt.err (!%p986_p13)
}
  0x32   : > { %s1118_s25 = smov 256   ;;  %s1119_s8 = smov 128  }
  0x33   : > { %s1120_s9 = smov 8   ;;  %p1734_p1 = scmp.ne.s32.totalorder %s1731_s29, 0 }
  0x34   : > { %900 = dma.hbm_to_vmem [thread:$0]  (!%p1225_p7), %s1235_s13, 1536, %s1237_s22, %s1239_s23, %s1118_s25, %s1119_s8, %s1120_s9  }
  0x35   : > { %199 = sbr.rel (%p1734_p1) target bundleno = 225 (0xe1), region = 28  ;;  %p1735_p4 = scmp.eq.s32.totalorder (!%p1734_p1), %s1170_s19, 0 }
  0x3a   : > { %1085 = dma.done.wait (%p1735_p4), [#allocation5], 16   ;;  %p1736_p6 = pmov %p1735_p4 }
  0x3b   : > { %s1267_s5 = sand.u32 1, %s1106_s16   ;;  %p1737_p11 = scmp.ne.s32.totalorder %s1728_s26, 0 }
  0x3c   : > { %1087 = vsyncadd (%p1736_p6), [#allocation5], 4294967280  ;;  %s880_s10 = smul.u32 96, %s1267_s5  ;;  %s206_s11 = scalar_lea.sflag [#allocation3], %s1267_s5 }
  0x3e   : > { %s209_s30 = scalar_lea.vmem [#allocation6], %s880_s10 }
  0x3f   : > { %1089 = dma.done.wait (%p1737_p11), %s206_s11, 1536  }
  0x40   : > { %1091 = vsyncadd (%p1737_p11), %s206_s11, 4294965760 }
  0x41   : > { %214 = sfence }
  0x42   : > { %v1275_v0 = vld [vmem:[%s209_s30] sm:$0xff]  ;;  %v1277_v1 = vld [vmem:[%s209_s30 + $0x8] sm:$0xff]  ;;  %v1281_v3 = vld [vmem:[%s209_s30 + $0x10] sm:$0xff]  ;;  %s1287_s29 = sld [smem:[#allocation2 + $0x3]]  ;;  %p1738_p13 = scmp.ne.s32.totalorder %s1729_s27, 0 }
  0x43   : > { %v310_v2 = vadd.f32 %v1277_v1, %v1275_v0  ;;  %v1283_v4 = vld [vmem:[%s209_s30 + $0x28] sm:$0xff]  ;;  %v1285_v5 = vld [vmem:[%s209_s30 + $0x38] sm:$0xff]  ;;  %s1290_s26 = sld [smem:[#allocation2 + $0x4]]  ;;  %v1296_v8 = vld [vmem:[%s209_s30 + $0x20] sm:$0xff] }
  0x44   : > { %v1292_v7 = vld [vmem:[%s209_s30 + $0x18] sm:$0xff]  ;;  %s1294_s6 = sld [smem:[#allocation2 + $0x5]]  ;;  %v1298_v9 = vld [vmem:[%s209_s30 + $0x30] sm:$0xff]  ;;  %v1300_v10 = vld [vmem:[%s209_s30 + $0x48] sm:$0xff]  ;;  %v389_v12 = vmul.f32 %v1283_v4, %v1275_v0  ;;  %v390_v13 = vmul.f32 %v1285_v5, %v1277_v1  ;;  %v400_v14 = vmul.f32 %v1296_v8, %v1275_v0  ;;  %v410_v21 = vmul.f32 %v1283_v4, %v1277_v1 }
  0x45   : > { %v317_v6 = vadd.f32 %v1281_v3, %v310_v2  ;;  %s1307_s13 = sld [smem:[#allocation2 + $0x6]]  ;;  %v401_v15 = vmul.f32 %v1298_v9, %v1277_v1  ;;  %v1315_v16 = vld [vmem:[%s209_s30 + $0x40] sm:$0xff]  ;;  %v1317_v17 = vld [vmem:[%s209_s30 + $0x50] sm:$0xff]  ;;  %v1319_v18 = vld [vmem:[%s209_s30 + $0x58] sm:$0xff]  ;;  %v397_v20 = vmul.f32 %v1292_v7, %v1275_v0  ;;  %v1330_v22 = vmul.f32 %v1300_v10, %v1281_v3 }
  0x46   : > { %s1313_s22 = sld [smem:[#allocation2 + $0x7]]  ;;  %v394_v23 = vmul.f32 %v1315_v16, %v1277_v1  ;;  %v395_v24 = vmul.f32 %v1317_v17, %v1281_v3  ;;  %v398_v25 = vmul.f32 %v1319_v18, %v1281_v3  ;;  %v391_v28 = vadd.f32 %v390_v13, %v389_v12 }
  0x47   : > { %v324_v11 = vadd.f32 %v1292_v7, %v317_v6  ;;  %s1326_s23 = sld [smem:[#allocation2 + $0x8]]  ;;  %v403_v29 = vmul.f32 %v1285_v5, %v1292_v7  ;;  %v1348_v32 = vadd.f32 %v401_v15, %v400_v14  ;;  %v404_v33 = vmul.f32 %v1300_v10, %v1296_v8 }
  0x48   : > { %s1338_s7 = sld [smem:[#allocation2 + $0x9]]  ;;  %v306_v26 = vstv %s1287_s29  ;;  %v406_v37 = vmul.f32 %v1315_v16, %v1292_v7  ;;  %v1361_v40 = vadd.f32 %v395_v24, %v394_v23  ;;  %v1363_v41 = vadd.f32 %v398_v25, %v397_v20 }
  0x49   : > { %v331_v19 = vadd.f32 %v1296_v8, %v324_v11  ;;  %s1344_s12 = sld [smem:[#allocation2 + $0xa]]  ;;  %v307_v30 = vmul.f32 %v306_v26, %v1275_v0  ;;  %v311_v31 = vstv %s1290_s26  ;;  %v1372_v47 = vadd.f32 %v1330_v22, %v391_v28 }
  0x4a   : > { %s1352_s14 = sld [smem:[#allocation2 + $0xb]]  ;;  %v312_v34 = vmul.f32 %v1277_v1, %v311_v31  ;;  %v318_v35 = vstv %s1294_s6  ;;  %v408_v48 = vmul.f32 %v1317_v17, %v1296_v8  ;;  %v411_v49 = vmul.f32 %v1319_v18, %v1296_v8  ;;  %s1469_s6 = sshll.u32 %s1267_s5, 3 }
  0x4b   : > { %v338_v27 = vadd.f32 %v1283_v4, %v331_v19  ;;  %v319_v38 = vmul.f32 %v1281_v3, %v318_v35  ;;  %v325_v39 = vstv %s1307_s13  ;;  %s1368_s25 = sld [smem:[#allocation2 + $0xc]]  ;;  %v407_v53 = vadd.f32 %v406_v37, %v389_v12 }
  0x4c   : > { %v313_v42 = vadd.f32 %v312_v34, %v307_v30  ;;  %v326_v43 = vmul.f32 %v1292_v7, %v325_v39  ;;  %v332_v44 = vstv %s1313_s22  ;;  %s1378_s8 = sld [smem:[#allocation2 + $0xd]]  ;;  %v413_v56 = vmul.f32 %v1283_v4, %v1281_v3 }
  0x4d   : > { %v345_v36 = vadd.f32 %v1298_v9, %v338_v27  ;;  %v339_v46 = vstv %s1326_s23  ;;  %v333_v51 = vmul.f32 %v1296_v8, %v332_v44  ;;  %v414_v57 = vmul.f32 %v1298_v9, %v1292_v7  ;;  %s1391_s9 = sld [smem:[#allocation2 + $0xe]] }
  0x4e   : > { %v320_v50 = vadd.f32 %v319_v38, %v313_v42  ;;  %v340_v54 = vmul.f32 %v1283_v4, %v339_v46  ;;  %v346_v55 = vstv %s1338_s7  ;;  %v422_v60 = vadd.f32 %v406_v37, %v390_v13  ;;  %s1419_s10 = sld [smem:[#allocation2 + $0x2]] }
  0x4f   : > { %v352_v45 = vadd.f32 %v1285_v5, %v345_v36  ;;  %v423_v61 = vmul.f32 %v1319_v18, %v1298_v9  ;;  %v353_v62 = vstv %s1344_s12  ;;  %v405_v63 = vadd.f32 %v404_v33, %v403_v29  ;;  %s1442_s11 = sld [smem:[#allocation2 + $0xf]]  ;;  %s244_s12 = scalar_lea.vmem [#allocation10], %s1469_s6 }
  0x50   : > { %v327_v58 = vadd.f32 %v326_v43, %v320_v50  ;;  %v416_v2 = vmul.f32 %v1315_v16, %v1283_v4  ;;  %v417_v6 = vmul.f32 %v1300_v10, %v1298_v9  ;;  %v347_v12 = vmul.f32 %v1298_v9, %v346_v55  ;;  %s1450_s30 = sld [smem:[#allocation2 + $0x10]] }
  0x51   : > { %v359_v52 = vadd.f32 %v1315_v16, %v352_v45  ;;  %v360_v14 = vstv %s1352_s14  ;;  %v1401_v15 = vadd.f32 %v408_v48, %v407_v53  ;;  %v1403_v19 = vadd.f32 %v411_v49, %v410_v21  ;;  %s1457_s29 = sld [smem:[#allocation2 + $0x11]] }
  0x52   : > { %v334_v11 = vadd.f32 %v333_v51, %v327_v58  ;;  %v1405_v20 = vadd.f32 %v414_v57, %v413_v56  ;;  %v419_v23 = vmul.f32 %v1285_v5, %v1275_v0  ;;  %v354_v25 = vmul.f32 %v1285_v5, %v353_v62  ;;  %s1461_s26 = sld [smem:[#allocation2 + $0x12]] }
  0x53   : > { %v366_v59 = vadd.f32 %v1300_v10, %v359_v52  ;;  %v1413_v27 = vadd.f32 %v423_v61, %v422_v60  ;;  %v361_v28 = vmul.f32 %v1315_v16, %v360_v14  ;;  %v367_v29 = vstv %s1368_s25  ;;  %s1474_s13 = sld [smem:[#allocation2 + $0x13]] }
  0x54   : > { %v341_v24 = vadd.f32 %v340_v54, %v334_v11  ;;  %v418_v30 = vadd.f32 %v417_v6, %v416_v2  ;;  %v420_v21 = vmul.f32 %v1317_v17, %v1298_v9  ;;  %v374_v33 = vstv %s1378_s8  ;;  %s1484_s22 = sld [smem:[#allocation2 + $0x14]] }
  0x55   : > { %v373_v13 = vadd.f32 %v1317_v17, %v366_v59  ;;  %v425_v34 = vmul.f32 %v1285_v5, %v1281_v3  ;;  %v437_v35 = vadd.f32 %v408_v48, %v1330_v22  ;;  %v428_v36 = vmul.f32 %v1317_v17, %v1283_v4  ;;  %s1493_s23 = sld [smem:[#allocation2 + $0x15]] }
  0x56   : > { %v348_v31 = vadd.f32 %v347_v12, %v341_v24  ;;  %v429_v37 = vmul.f32 %v1319_v18, %v1285_v5  ;;  %v442_v38 = vmul.f32 %v1372_v47, %v1372_v47  ;;  %v443_v39 = vmul.f32 %v1401_v15, %v1401_v15  ;;  %s1500_s7 = sld [smem:[#allocation2 + $0x16]] }
  0x57   : > { %v1411_v26 = vadd.f32 %v1319_v18, %v373_v13  ;;  %v368_v43 = vmul.f32 %v1300_v10, %v367_v29  ;;  %v1434_v44 = vadd.f32 %v437_v35, %v423_v61  ;;  %v445_v22 = vmul.f32 %v1413_v27, %v1413_v27  ;;  %s1514_s14 = sld [smem:[#allocation2 + $0x17]] }
  0x58   : > { %v355_v42 = vadd.f32 %v354_v25, %v348_v31  ;;  %v375_v45 = vmul.f32 %v1317_v17, %v374_v33  ;;  %v381_v46 = vstv %s1391_s9  ;;  %v444_v48 = vadd.f32 %v443_v39, %v442_v38  ;;  %s1521_s25 = sld [smem:[#allocation2 + $0x18]] }
  0x59   : > { %v449_v49 = vmul.f32 %v1283_v4, %v1361_v40  ;;  %v426_v51 = vmul.f32 %v1315_v16, %v1296_v8  ;;  %v447_v52 = vmul.f32 %v1434_v44, %v1434_v44  ;;  %v452_v53 = vmul.f32 %v1285_v5, %v1363_v41  ;;  %s1527_s8 = sld [smem:[#allocation2 + $0x19]] }
  0x5a   : > { %v362_v50 = vadd.f32 %v361_v28, %v355_v42  ;;  %v1452_v54 = vadd.f32 %v429_v37, %v428_v36  ;;  %v446_v55 = vadd.f32 %v445_v22, %v444_v48  ;;  %v450_v56 = vmul.f32 %v405_v63, %v1361_v40  ;;  %s1531_s9 = sld [smem:[#allocation2 + $0x1a]] }
  0x5b   : > { %v456_v57 = vmul.f32 %v1300_v10, %v1348_v32  ;;  %v382_v59 = vmul.f32 %v1319_v18, %v381_v46  ;;  %v453_v60 = vadd.f32 %v452_v53, %v449_v49  ;;  %v460_v61 = vmul.f32 %v405_v63, %v1275_v0 }
  0x5c   : > { %v369_v58 = vadd.f32 %v368_v43, %v362_v50  ;;  %v431_v62 = vmul.f32 %v1300_v10, %v1275_v0  ;;  %v432_v2 = vmul.f32 %v1319_v18, %v1315_v16  ;;  %v448_v40 = vadd.f32 %v447_v52, %v446_v55 }
  0x5d   : > { %v454_v6 = vmul.f32 %v418_v30, %v1363_v41  ;;  %v387_v12 = vstv %s1419_s10  ;;  %v457_v14 = vadd.f32 %v456_v57, %v453_v60  ;;  %v463_v13 = vmul.f32 %v1315_v16, %v1403_v19  ;;  %s230_s10 = scalar_lea.vmem [#allocation7], %s1469_s6 }
  0x5e   : > { %v376_v11 = vadd.f32 %v375_v45, %v369_v58  ;;  %v421_v63 = vadd.f32 %v420_v21, %v419_v23  ;;  %v427_v24 = vadd.f32 %v426_v51, %v425_v34  ;;  %v451_v25 = vadd.f32 %v450_v56, %v448_v40 }
  0x5f   : > { %v1478_v28 = vmul.f32 %v1452_v54, %v1348_v32  ;;  %v434_v41 = vmul.f32 %v1300_v10, %v1277_v1  ;;  %v461_v31 = vadd.f32 %v460_v61, %v457_v14  ;;  %v467_v33 = vmul.f32 %v1317_v17, %v1405_v20 }
  0x60   : > { %v383_v29 = vadd.f32 %v382_v59, %v376_v11  ;;  %v433_v35 = vadd.f32 %v432_v2, %v431_v62  ;;  %v435_v23 = vmul.f32 %v1317_v17, %v1292_v7  ;;  %v439_v32 = vadd.f32 %v1401_v15, %v1372_v47 }
  0x61   : > { %v455_v21 = vadd.f32 %v454_v6, %v451_v25  ;;  %v464_v36 = vadd.f32 %v463_v13, %v461_v31  ;;  %v471_v37 = vmul.f32 %v1277_v1, %v418_v30  ;;  %v308_v38 = vstv %s1442_s11  ;;  %s644_s11 = sshll.u32 %s230_s10, 4  ;;  %s1564_s11 = int_to_ptr.vmem [resolvable:$true] %s644_s11 }
  0x62   : > { %v1490_v34 = vadd.f32 %v387_v12, %v383_v29  ;;  %v465_v42 = vmul.f32 %v421_v63, %v1403_v19  ;;  %v474_v43 = vmul.f32 %v1292_v7, %v421_v63  ;;  %v309_v22 = vmul.f32 %v308_v38, %v1275_v0 }
  0x63   : > { %v459_v39 = vadd.f32 %v1478_v28, %v455_v21  ;;  %v468_v47 = vadd.f32 %v467_v33, %v464_v36  ;;  %v314_v15 = vstv %s1450_s30  ;;  %v321_v45 = vstv %s1457_s29  ;;  %s1560_s30 = sshll.u32 %s1170_s19, 7 }
  0x64   : > { %v328_v46 = vstv %s1461_s26  ;;  %619 = vst [vmem:[%s244_s12] sm:$0xff] %v1490_v34  ;;  %v469_v48 = vmul.f32 %v433_v35, %v1405_v20  ;;  %v315_v19 = vmul.f32 %v1277_v1, %v314_v15  ;;  %v322_v49 = vmul.f32 %v1281_v3, %v321_v45 }
  0x65   : > { %v462_v30 = vadd.f32 %v459_v39, %v450_v56  ;;  %v440_v0 = vadd.f32 %v439_v32, %v1413_v27  ;;  %v472_v50 = vadd.f32 %v471_v37, %v468_v47  ;;  %v477_v51 = vmul.f32 %v1319_v18, %v427_v24 }
  0x66   : > { %v335_v52 = vstv %s1474_s13  ;;  %v436_v53 = vadd.f32 %v435_v23, %v434_v41  ;;  %v316_v57 = vadd.f32 %v315_v19, %v309_v22  ;;  %v329_v56 = vmul.f32 %v1292_v7, %v328_v46  ;;  %s1570_s13 = scalar_lea.hbm %s1720_s2, %s1560_s30 }
  0x67   : > { %v466_v55 = vadd.f32 %v465_v42, %v462_v30  ;;  %v475_v58 = vadd.f32 %v474_v43, %v472_v50  ;;  %v481_v1 = vmul.f32 %v1281_v3, %v1452_v54  ;;  %v342_v20 = vstv %s1484_s22  ;;  %s621_s22 = scalar_lea.sflag [#allocation4], %s1267_s5 }
  0x68   : > { %v323_v27 = vadd.f32 %v322_v49, %v316_v57  ;;  %v336_v60 = vmul.f32 %v1296_v8, %v335_v52  ;;  %v441_v61 = vadd.f32 %v440_v0, %v1434_v44  ;;  %v484_v2 = vmul.f32 %v1296_v8, %v433_v35 }
  0x69   : > { %v470_v59 = vadd.f32 %v469_v48, %v466_v55  ;;  %v478_v62 = vadd.f32 %v477_v51, %v475_v58  ;;  %v349_v40 = vstv %s1493_s23  ;;  %v479_v11 = vmul.f32 %v436_v53, %v427_v24  ;;  %s990_s23 = scalar_lea.vmem %s1564_s11, 128 }
  0x6a   : > { %v330_v3 = vadd.f32 %v329_v56, %v323_v27  ;;  %v343_v54 = vmul.f32 %v1283_v4, %v342_v20  ;;  %v487_v14 = vmul.f32 %v1298_v9, %v436_v53  ;;  %v356_v13 = vstv %s1500_s7  ;;  %p991_p12 = scmp.ne.s32.totalorder %s1564_s11, %s990_s23  ;;  %s1121_s7 = smov [#allocation7]  }
  0x6b   : > { %v473_v7 = vadd.f32 %v470_v59, %v454_v6  ;;  %v482_v12 = vadd.f32 %v481_v1, %v478_v62  ;;  %v350_v8 = vmul.f32 %v1298_v9, %v349_v40  ;;  %v1535_v29 = vmul.f32 0.5, %v441_v61 }
  0x6c   : > { %v337_v63 = vadd.f32 %v336_v60, %v330_v3  ;;  %v363_v6 = vstv %s1514_s14  ;;  %v492_v41 = vmul.f32 %v441_v61, %v441_v61  ;;  %v357_v4 = vmul.f32 %v1285_v5, %v356_v13  ;;  %p992_p7 = pnand %p991_p12, %p1738_p13  ;;  %s994_s14 = sshll.u32 %s1121_s7, 4  ;;  %s995_s14 = int_to_ptr.vmem [resolvable:$false] %s994_s14 }
  0x6d   : > { %v476_v44 = vadd.f32 %v473_v7, %v465_v42  ;;  %v485_v25 = vadd.f32 %v484_v2, %v482_v12  ;;  %v364_v32 = vmul.f32 %v1315_v16, %v363_v6  ;;  %v370_v21 = vstv %s1521_s25  ;;  %s996_s25 = scalar_lea.vmem %s995_s14, 256  ;;  %p997_p9 = scmp.lt.s32.totalorder %s1564_s11, %s995_s14 }
  0x6e   : > { %v344_v31 = vadd.f32 %v343_v54, %v337_v63  ;;  %v493_v39 = vmul.f32 0.5, %v492_v41  ;;  %v377_v43 = vstv %s1527_s8  ;;  %v371_v5 = vmul.f32 %v1300_v10, %v370_v21  ;;  %p993_p8 = pneg %p992_p7  ;;  %p998_p10 = scmp.lt.s32.totalorder %s996_s25, %s990_s23 }
  0x6f   : > { %v480_v24 = vadd.f32 %v479_v11, %v476_v44  ;;  %v488_v33 = vadd.f32 %v487_v14, %v485_v25  ;;  %v384_v47 = vstv %s1531_s9  ;;  %v378_v30 = vmul.f32 %v1317_v17, %v377_v43 }
  0x70   : > { %v351_v23 = vadd.f32 %v350_v8, %v344_v31  ;;  %v385_v51 = vmul.f32 %v1319_v18, %v384_v47  ;;  %p999_p2 = por %p998_p10, %p997_p9 }
  0x71   : > { %v483_v35 = vadd.f32 %v480_v24, %v1478_v28  ;;  %v1542_v36 = vmul.f32 0.33333334, %v488_v33  ;;  %v496_v9 = vmul.f32 0.16666667, %v488_v33  ;;  %v500_v37 = vmul.f32 %v1535_v29, %v488_v33 }
  0x72   : > { %v358_v42 = vadd.f32 %v357_v4, %v351_v23  ;;  %p1000_p0 = pnand %p999_p2, %p993_p8 }
  0x73   : > { %v486_v38 = vadd.f32 %v483_v35, %v469_v48  ;;  %v501_v22 = vmul.f32 %v1542_v36, %v441_v61  ;;  %v497_v15 = vadd.f32 %v496_v9, %v1535_v29  ;;  %v506_v16 = vmul.f32 %v1542_v36, %v488_v33 }
  0x74   : > { %v365_v45 = vadd.f32 %v364_v32, %v358_v42 }
  0x75   : > { %v489_v28 = vadd.f32 %v486_v38, %v479_v11  ;;  %v502_v46 = vadd.f32 %v501_v22, %v500_v37 }
  0x76   : > { %v372_v10 = vadd.f32 %v371_v5, %v365_v45 }
  0x77   : > { %v494_v48 = vsub.f32 %v489_v28, %v493_v39  ;;  %v498_v19 = vmul.f32 0.041666668, %v489_v28  ;;  %v505_v49 = vmul.f32 %v1535_v29, %v489_v28  ;;  %v513_v0 = vmul.f32 %v1542_v36, %v489_v28 }
  0x78   : > { %v512_v50 = vmul.f32 %v502_v46, %v1535_v29  ;;  %v503_v55 = vmul.f32 0.008333334, %v502_v46  ;;  %v379_v56 = vadd.f32 %v378_v30, %v372_v10  ;;  %v520_v60 = vmul.f32 %v502_v46, %v1542_v36 }
  0x79   : > { %v1557_v52 = vmul.f32 0.25, %v494_v48  ;;  %v499_v53 = vadd.f32 %v498_v19, %v497_v15  ;;  %v507_v57 = vadd.f32 %v506_v16, %v505_v49 }
  0x7a   : > { %v514_v17 = vadd.f32 %v513_v0, %v512_v50  ;;  %v386_v18 = vadd.f32 %v385_v51, %v379_v56 }
  0x7b   : > { %v508_v58 = vmul.f32 %v1557_v52, %v441_v61  ;;  %v515_v1 = vmul.f32 %v1557_v52, %v488_v33  ;;  %v504_v20 = vadd.f32 %v503_v55, %v499_v53  ;;  %v522_v61 = vmul.f32 %v1557_v52, %v489_v28 }
  0x7c   : > { %617 = vst [vmem:[%s230_s10] sm:$0xff] %v386_v18 }
  0x7d   : > { %v509_v59 = vadd.f32 %v508_v58, %v507_v57  ;;  %v516_v27 = vadd.f32 %v515_v1, %v514_v17 }
  0x7f   : > { %v510_v62 = vmul.f32 0.0013888889, %v509_v59  ;;  %v517_v2 = vmul.f32 0.0001984127, %v516_v27  ;;  %v519_v40 = vmul.f32 %v509_v59, %v1535_v29  ;;  %v526_v7 = vmul.f32 %v516_v27, %v1535_v29 }
  0x80   : > { %1003 = shalt.err (!%p1000_p0)
}
  0x81   : > { %s1004_s8 = scalar_lea.hbm %s1570_s13, 128  ;;  %s1008_s10 = scalar_lea.hbm %s1720_s2, 256 }
  0x82   : > { %p1005_p3 = scmp.ne.s32.totalorder %s1570_s13, %s1004_s8  ;;  %p1009_p4 = scmp.lt.s32.totalorder %s1570_s13, %s1720_s2 }
  0x83   : > { %p1010_p6 = scmp.lt.s32.totalorder %s1008_s10, %s1004_s8 }
  0x84   : > { %p1006_p5 = pnand %p1005_p3, %p1738_p13 }
  0x85   : > { %p1011_p11 = por %p1010_p6, %p1009_p4 }
  0x86   : > { %p1007_p1 = pneg %p1006_p5 }
  0x88   : > { %p1012_p12 = pnand %p1011_p11, %p1007_p1 }
  0x8a   : > { %1015 = shalt.err (!%p1012_p12)
}
  0x8b   : > { %887 = dma.vmem_to_hbm [thread:$0]  (%p1738_p13), %s1564_s11, 128, %s1570_s13, %s621_s22   ;;  %v527_v11 = vmul.f32 %v509_v59, %v1542_v36  ;;  %v529_v3 = vmul.f32 %v502_v46, %v1557_v52  ;;  %v511_v54 = vadd.f32 %v510_v62, %v504_v20  ;;  %v521_v12 = vadd.f32 %v520_v60, %v519_v40 }
  0x8c   : > { %v534_v63 = vmul.f32 %v516_v27, %v1542_v36  ;;  %v536_v24 = vmul.f32 %v509_v59, %v1557_v52  ;;  %v543_v33 = vmul.f32 %v516_v27, %v1557_v52  ;;  %s834_s11 = sld [smem:[#allocation2 + $0x1]]  ;;  %s237_s22 = scalar_lea.vmem [#allocation8], %s1469_s6 }
  0x8d   : > { %v528_v14 = vadd.f32 %v527_v11, %v526_v7  ;;  %v518_v13 = vadd.f32 %v517_v2, %v511_v54  ;;  %v523_v44 = vadd.f32 %v522_v61, %v521_v12  ;;  %s245_s13 = sld [smem:[#allocation2]]  ;;  %s657_s23 = sshll.u32 %s237_s22, 4  ;;  %s1637_s23 = int_to_ptr.vmem [resolvable:$true] %s657_s23 }
  0x8e   : > { %s625_s7 = sand.u32 1, %s1170_s19   ;;  %s670_s14 = sshll.u32 %s244_s12, 4  ;;  %s1646_s14 = int_to_ptr.vmem [resolvable:$true] %s670_s14 }
  0x8f   : > { %v530_v8 = vadd.f32 %v529_v3, %v528_v14  ;;  %v524_v25 = vmul.f32 2.4801588e-05, %v523_v44  ;;  %v533_v6 = vmul.f32 %v523_v44, %v1535_v29  ;;  %v541_v41 = vmul.f32 %v523_v44, %v1542_v36  ;;  %s1644_s5 = scalar_lea.hbm %s1721_s3, %s1560_s30  ;;  %s1652_s19 = scalar_lea.hbm %s1722_s4, %s1560_s30 }
  0x90   : > { %v550_v43 = vmul.f32 %v523_v44, %v1557_v52  ;;  %s1654_s6 = scalar_lea.sflag [#allocation9], %s625_s7  ;;  %s1016_s12 = scalar_lea.vmem %s1637_s23, 128 }
  0x91   : > { %v531_v31 = vmul.f32 2.7557319e-06, %v530_v8  ;;  %v540_v4 = vmul.f32 %v530_v8, %v1535_v29  ;;  %v525_v35 = vadd.f32 %v524_v25, %v518_v13  ;;  %v535_v23 = vadd.f32 %v534_v63, %v533_v6  ;;  %p1017_p7 = scmp.ne.s32.totalorder %s1637_s23, %s1016_s12  ;;  %s1122_s29 = smov [#allocation8]  }
  0x92   : > { %v548_v37 = vmul.f32 %v530_v8, %v1542_v36  ;;  %v557_v28 = vmul.f32 %v530_v8, %v1557_v52  ;;  %s1020_s26 = sshll.u32 %s1122_s29, 4  ;;  %s1021_s26 = int_to_ptr.vmem [resolvable:$false] %s1020_s26 }
  0x93   : > { %v542_v32 = vadd.f32 %v541_v41, %v540_v4  ;;  %v532_v21 = vadd.f32 %v531_v31, %v525_v35  ;;  %v537_v9 = vadd.f32 %v536_v24, %v535_v23  ;;  %p1018_p8 = pnand %p1017_p7, %p1738_p13  ;;  %p1023_p10 = scmp.lt.s32.totalorder %s1637_s23, %s1021_s26 }
  0x95   : > { %v544_v38 = vadd.f32 %v543_v33, %v542_v32  ;;  %v538_v39 = vmul.f32 2.755732e-07, %v537_v9  ;;  %v547_v42 = vmul.f32 %v537_v9, %v1535_v29  ;;  %v555_v22 = vmul.f32 %v537_v9, %v1542_v36  ;;  %p1019_p9 = pneg %p1018_p8 }
  0x96   : > { %v564_v50 = vmul.f32 %v537_v9, %v1557_v52 }
  0x97   : > { %v545_v5 = vmul.f32 2.5052108e-08, %v544_v38  ;;  %v554_v47 = vmul.f32 %v544_v38, %v1535_v29  ;;  %v539_v15 = vadd.f32 %v538_v39, %v532_v21  ;;  %v549_v16 = vadd.f32 %v548_v37, %v547_v42 }
  0x98   : > { %v562_v48 = vmul.f32 %v544_v38, %v1542_v36  ;;  %v571_v55 = vmul.f32 %v544_v38, %v1557_v52 }
  0x99   : > { %v556_v45 = vadd.f32 %v555_v22, %v554_v47  ;;  %v546_v46 = vadd.f32 %v545_v5, %v539_v15  ;;  %v551_v30 = vadd.f32 %v550_v43, %v549_v16  ;;  %v612_v47 = vstv %s834_s11  ;;  %s1022_s11 = scalar_lea.vmem %s1021_s26, 256 }
  0x9a   : > { %v613_v16 = vmul.f32 %v612_v47, %v1411_v26  ;;  %p1024_p2 = scmp.lt.s32.totalorder %s1022_s11, %s1016_s12 }
  0x9b   : > { %v558_v19 = vadd.f32 %v557_v28, %v556_v45  ;;  %v552_v49 = vmul.f32 2.0876756e-09, %v551_v30  ;;  %v561_v0 = vmul.f32 %v551_v30, %v1535_v29  ;;  %v569_v10 = vmul.f32 %v551_v30, %v1542_v36 }
  0x9c   : > { %v578_v60 = vmul.f32 %v551_v30, %v1557_v52  ;;  %p1025_p0 = por %p1024_p2, %p1023_p10 }
  0x9d   : > { %v559_v51 = vmul.f32 1.6059044e-10, %v558_v19  ;;  %v568_v53 = vmul.f32 %v558_v19, %v1535_v29  ;;  %v553_v57 = vadd.f32 %v552_v49, %v546_v46  ;;  %v563_v17 = vadd.f32 %v562_v48, %v561_v0 }
  0x9e   : > { %v576_v18 = vmul.f32 %v558_v19, %v1542_v36  ;;  %v585_v40 = vmul.f32 %v558_v19, %v1557_v52  ;;  %p1026_p3 = pnand %p1025_p0, %p1019_p9 }
  0x9f   : > { %v570_v56 = vadd.f32 %v569_v10, %v568_v53  ;;  %v560_v58 = vadd.f32 %v559_v51, %v553_v57  ;;  %v565_v1 = vadd.f32 %v564_v50, %v563_v17 }
  0xa1   : > { %v572_v20 = vadd.f32 %v571_v55, %v570_v56  ;;  %v566_v59 = vmul.f32 1.1470745e-11, %v565_v1  ;;  %v575_v27 = vmul.f32 %v565_v1, %v1535_v29  ;;  %v583_v61 = vmul.f32 %v565_v1, %v1542_v36 }
  0xa2   : > { %v592_v8 = vmul.f32 %v565_v1, %v1557_v52 }
  0xa3   : > { %v573_v62 = vmul.f32 7.6471636e-13, %v572_v20  ;;  %v582_v2 = vmul.f32 %v572_v20, %v1535_v29  ;;  %v567_v7 = vadd.f32 %v566_v59, %v560_v58  ;;  %v577_v11 = vadd.f32 %v576_v18, %v575_v27 }
  0xa4   : > { %v590_v14 = vmul.f32 %v572_v20, %v1542_v36  ;;  %v599_v41 = vmul.f32 %v572_v20, %v1557_v52 }
  0xa5   : > { %v584_v3 = vadd.f32 %v583_v61, %v582_v2  ;;  %v574_v54 = vadd.f32 %v573_v62, %v567_v7  ;;  %v579_v12 = vadd.f32 %v578_v60, %v577_v11 }
  0xa7   : > { %v586_v13 = vadd.f32 %v585_v40, %v584_v3  ;;  %v580_v44 = vmul.f32 4.7794773e-14, %v579_v12  ;;  %v589_v63 = vmul.f32 %v579_v12, %v1535_v29  ;;  %v597_v25 = vmul.f32 %v579_v12, %v1542_v36 }
  0xa8   : > { %v606_v38 = vmul.f32 %v579_v12, %v1557_v52 }
  0xa9   : > { %v587_v6 = vmul.f32 2.8114574e-15, %v586_v13  ;;  %v596_v24 = vmul.f32 %v586_v13, %v1535_v29  ;;  %v581_v31 = vadd.f32 %v580_v44, %v574_v54  ;;  %v591_v4 = vadd.f32 %v590_v14, %v589_v63 }
  0xaa   : > { %v604_v32 = vmul.f32 %v586_v13, %v1542_v36  ;;  %v610_v36 = vstv %s245_s13 }
  0xab   : > { %v598_v33 = vadd.f32 %v597_v25, %v596_v24  ;;  %v588_v35 = vadd.f32 %v587_v6, %v581_v31  ;;  %v593_v23 = vadd.f32 %v592_v8, %v591_v4 }
  0xad   : > { %v600_v21 = vadd.f32 %v599_v41, %v598_v33  ;;  %v594_v9 = vmul.f32 1.5619207e-16, %v593_v23  ;;  %v603_v37 = vmul.f32 %v593_v23, %v1535_v29 }
  0xaf   : > { %v601_v39 = vmul.f32 8.220635e-18, %v600_v21  ;;  %v595_v42 = vadd.f32 %v594_v9, %v588_v35  ;;  %v605_v43 = vadd.f32 %v604_v32, %v603_v37 }
  0xb1   : > { %v602_v22 = vadd.f32 %v601_v39, %v595_v42  ;;  %v607_v5 = vadd.f32 %v606_v38, %v605_v43 }
  0xb3   : > { %v608_v28 = vmul.f32 4.1103176e-19, %v607_v5 }
  0xb5   : > { %v609_v15 = vadd.f32 %v608_v28, %v602_v22 }
  0xb7   : > { %v611_v45 = vmul.f32 %v610_v36, %v609_v15 }
  0xb9   : > { %v614_v29 = vadd.f32 %v613_v16, %v611_v45 }
  0xbb   : > { %v615_v52 = vsub.f32 0.0, %v614_v29 }
  0xbd   : > { %v616_v46 = vsub.f32 %v1490_v34, %v615_v52 }
  0xbf   : > { %618 = vst [vmem:[%s237_s22] sm:$0xff] %v616_v46 }
  0xc0   : > { %1029 = shalt.err (!%p1026_p3)
}
  0xc1   : > { %s1030_s30 = scalar_lea.hbm %s1644_s5, 128  ;;  %s1034_s7 = scalar_lea.hbm %s1721_s3, 256 }
  0xc2   : > { %p1031_p5 = scmp.ne.s32.totalorder %s1644_s5, %s1030_s30  ;;  %p1035_p6 = scmp.lt.s32.totalorder %s1644_s5, %s1721_s3 }
  0xc3   : > { %p1036_p11 = scmp.lt.s32.totalorder %s1034_s7, %s1030_s30 }
  0xc4   : > { %p1032_p1 = pnand %p1031_p5, %p1738_p13 }
  0xc5   : > { %p1037_p12 = por %p1036_p11, %p1035_p6 }
  0xc6   : > { %p1033_p4 = pneg %p1032_p1 }
  0xc8   : > { %p1038_p7 = pnand %p1037_p12, %p1033_p4 }
  0xca   : > { %1041 = shalt.err (!%p1038_p7)
}
  0xcb   : > { %888 = dma.vmem_to_hbm [thread:$0]  (%p1738_p13), %s1637_s23, 128, %s1644_s5, %s1654_s6  }
  0xcc   : > { %s1042_s9 = scalar_lea.vmem %s1646_s14, 128  ;;  %s1123_s10 = smov [#allocation10]  }
  0xcd   : > { %p1043_p8 = scmp.ne.s32.totalorder %s1646_s14, %s1042_s9  ;;  %s1046_s12 = sshll.u32 %s1123_s10, 4  ;;  %s1047_s12 = int_to_ptr.vmem [resolvable:$false] %s1046_s12 }
  0xce   : > { %s1048_s29 = scalar_lea.vmem %s1047_s12, 256  ;;  %p1049_p2 = scmp.lt.s32.totalorder %s1646_s14, %s1047_s12 }
  0xcf   : > { %p1044_p9 = pnand %p1043_p8, %p1738_p13  ;;  %p1050_p0 = scmp.lt.s32.totalorder %s1048_s29, %s1042_s9 }
  0xd1   : > { %p1045_p10 = pneg %p1044_p9  ;;  %p1051_p3 = por %p1050_p0, %p1049_p2 }
  0xd3   : > { %p1052_p5 = pnand %p1051_p3, %p1045_p10 }
  0xd5   : > { %1055 = shalt.err (!%p1052_p5)
}
  0xd6   : > { %s1056_s26 = scalar_lea.hbm %s1652_s19, 128  ;;  %s1060_s11 = scalar_lea.hbm %s1722_s4, 256 }
  0xd7   : > { %p1057_p1 = scmp.ne.s32.totalorder %s1652_s19, %s1056_s26  ;;  %p1061_p11 = scmp.lt.s32.totalorder %s1652_s19, %s1722_s4 }
  0xd8   : > { %p1062_p12 = scmp.lt.s32.totalorder %s1060_s11, %s1056_s26 }
  0xd9   : > { %p1058_p4 = pnand %p1057_p1, %p1738_p13 }
  0xda   : > { %p1063_p7 = por %p1062_p12, %p1061_p11 }
  0xdb   : > { %p1059_p6 = pneg %p1058_p4 }
  0xdd   : > { %p1064_p8 = pnand %p1063_p7, %p1059_p6 }
  0xdf   : > { %1067 = shalt.err (!%p1064_p8)
}
  0xe0   : > { %889 = dma.vmem_to_hbm [thread:$0]  (%p1738_p13), %s1646_s14, 128, %s1652_s19, %s1654_s6  }
  0xe1 PF: > { %s682_s22 = sand.u32 1, %s1102_s15   ;;  %p1739_p9 = scmp.ne.s32.totalorder %s1730_s28, 0 }
  0xe2   : > { %p1740_p10 = scmp.ge.s32.totalorder %s1114_s18, 2  ;;  %s683_s7 = scalar_lea.sflag [#allocation4], %s682_s22 }
  0xe4   : > { %p902_p2 = pnand %p1740_p10, %p1739_p9 }
  0xe6   : > { %p903_p0 = pneg %p902_p2 }
  0xe8   : > { %1093 = dma.done.wait (%p903_p0), %s683_s7, 128  }
  0xe9   : > { %1095 = vsyncadd (%p903_p0), %s683_s7, 4294967168  ;;  %s691_s25 = sand.u32 1, %s824_s20  }
  0xea   : > { %s692_s27 = scalar_lea.sflag [#allocation9], %s691_s25 }
  0xeb   : > { %1097 = dma.done.wait (%p903_p0), %s692_s27, 256  }
  0xec   : > { %1099 = vsyncadd (%p903_p0), %s692_s27, 4294967040  ;;  %p22_p13 = scmp.ge.s32.totalorder %s1174_s21, 4   ;;  %s1741_s15 = smov %s1106_s16 }
  0xed   : > { %s1742_s16 = smov %s1110_s17  ;;  %s1743_s17 = smov %s1186_s24 }
  0xee   : > { %s1744_s18 = smov %s1174_s21  ;;  %24 = sbr.rel (!%p22_p13) target bundleno = 8 (0x8), region = 121 }
  0xf3   :  { %706 = vsyncpa [#allocation3], 1 }
  0xf4   :  { %708 = vsyncpa [#allocation3 + $0x1], 1 }
  0xf5   :  { %709 = vsyncpa [#allocation4], 1 }
  0xf6   :  { %711 = vsyncpa [#allocation4 + $0x1], 1 }
  0xf7   :  { %712 = vsyncpa [#allocation9], 1 }
  0xf8   :  { %714 = vsyncpa [#allocation9 + $0x1], 1 }
  0xf9   :  { %715 = vsyncpa [#allocation5], 1 }
  0xfa   :  { %717 = vsyncpa [#allocation5 + $0x1], 1 }

</bundles_post_ra>
